<compile_context>
chip_gen: v6e
topology: v6e:2x2x1
jax: 0.10.0
libtpu: 0.0.40
codegen_flags: <defaults>
</compile_context>

<pallas_src>
import jax
import jax.numpy as jnp
from jax.experimental import pallas as pl
from jax.experimental.pallas import tpu as pltpu

_NEG_BIG = -1e30  # finite "-inf" so masked-row arithmetic never produces inf/nan


def _round_up(a, b):
    return (a + b - 1) // b * b


def _breadth_kernel(blk_ref, h_ref, a_src_ref, a_dst_ref, bias_ref, adj_ref,
                    out_ref, m_ref, l_ref, acc_ref):
    qi = pl.program_id(0)
    ki = pl.program_id(1)
    nk = pl.num_programs(1)

    # ---- init accumulators once per destination (row) tile ----
    @pl.when(ki == 0)
    def _init():
        m_ref[...] = jnp.full(m_ref.shape, _NEG_BIG, dtype=jnp.float32)
        l_ref[...] = jnp.zeros(l_ref.shape, dtype=jnp.float32)
        acc_ref[...] = jnp.zeros(acc_ref.shape, dtype=jnp.float32)

    # ---- block-sparse skip: only touch EUP/MXU if this (qi, ki) tile has edges ----
    @pl.when(blk_ref[qi * nk + ki] != 0)
    def _compute():
        # logits + LeakyReLU(0.2) + single mask pass (scalar -1e30 fill)
        s = a_dst_ref[...] + a_src_ref[...]                      # (Tq, Tk) broadcast
        s = jnp.where(s > 0, s, 0.2 * s)
        mask = adj_ref[...] != 0                                 # int8 adjacency
        s = jnp.where(mask, s, _NEG_BIG)

        # online softmax update (masked entries' exp underflows to 0)
        m_prev = m_ref[...]
        m_new = jnp.maximum(m_prev, jnp.max(s, axis=-1, keepdims=True))
        corr = jnp.exp(m_prev - m_new)
        p = jnp.exp(s - m_new)                                   # (Tq, Tk) f32
        l_ref[...] = corr * l_ref[...] + jnp.sum(p, axis=-1, keepdims=True)
        # bf16 x bf16 MXU matmul, f32 accumulate
        acc_ref[...] = corr * acc_ref[...] + jnp.dot(
            p.astype(jnp.bfloat16), h_ref[...],
            preferred_element_type=jnp.float32)                  # (Tq, F_pad)
        m_ref[...] = m_new

    # ---- finalize: normalize, bias, tanh; full 128-lane store ----
    @pl.when(ki == nk - 1)
    def _finalize():
        l = l_ref[...]
        # Rows that never saw a valid logit only exist among padded rows (sliced off
        # by the wrapper); guard them so no NaN is ever materialized.
        l_safe = jnp.where(l > 0, l, 1.0)
        inv_l = pl.reciprocal(l_safe, approx=False)
        out_ref[...] = jnp.tanh(acc_ref[...] * inv_l + bias_ref[...])


def breadth_forward(x, w, att_src, att_dst, bias, adj, *, tq=None, tk=None):
    """x: [N, F_in], w: [F_in, F_out], att_*: [1, F_out], bias: [1, F_out],
    adj: [N, N] dense mask with adj[dst, src] = 1 (self loops included)."""
    N, _ = x.shape
    f_out = w.shape[1]
    f_pad = _round_up(max(f_out, 1), 128)

    # ---- tile heuristics: decoupled Tq / Tk; keep nq >= 2 where possible (v7x) ----
    if tk is None:
        tk = min(512, _round_up(N, 128))                 # lane-aligned key tile
    if tq is None:
        tq = min(1024, _round_up(N, 8))                  # sublane-aligned query tile
        if _round_up(N, tq) // tq < 2 and tq > 8:
            tq = max(8, _round_up(-(-N // 2), 8))        # split q so both v7x TCs work
    n_q = _round_up(N, tq)
    n_k = _round_up(N, tk)
    nq, nk = n_q // tq, n_k // tk

    xf = x.astype(jnp.float32)
    wf = w.astype(jnp.float32)

    # ---- hoisted projection + attention reductions (single XLA matmuls) ----
    h = xf @ wf                                          # (N, F_out) f32
    a_src = h @ att_src.astype(jnp.float32).T            # (N, 1)
    a_dst = h @ att_dst.astype(jnp.float32).T            # (N, 1)

    # Lane padding (zeros are inert: padded columns are masked, padded features are 0).
    h_pad = jnp.zeros((n_k, f_pad), jnp.bfloat16).at[:N, :f_out].set(
        h.astype(jnp.bfloat16))
    a_src_pad = jnp.zeros((1, n_k), jnp.float32).at[0, :N].set(a_src[:, 0])
    a_dst_pad = jnp.zeros((n_q, 1), jnp.float32).at[:N, 0].set(a_dst[:, 0])
    bias_pad = jnp.zeros((1, f_pad), jnp.float32).at[:, :f_out].set(
        bias.astype(jnp.float32))

    # int8 adjacency; self loops on the padded diagonal keep padded rows finite.
    adj_i8 = jnp.zeros((n_q, n_k), jnp.int8).at[:N, :N].set(
        (adj > 0.5).astype(jnp.int8))
    d = jnp.arange(min(n_q, n_k))
    adj_i8 = adj_i8.at[d, d].set(jnp.int8(1))

    # Per-(qi, ki) "block has any edge" table (scalar-prefetched to SMEM, 1D).
    blk = jnp.any(adj_i8.reshape(nq, tq, nk, tk) != 0,
                  axis=(1, 3)).astype(jnp.int32).reshape(-1)

    # ---- VMEM budget from the actual tile footprint (double-buffered streams) ----
    tile_vmem = (2 * tk * f_pad * 2                      # h (bf16)
                 + 2 * (tk * 4 + tq * 4 + f_pad * 4)     # a_src, a_dst, bias
                 + 2 * tq * tk * 1                       # adj (int8)
                 + 2 * tq * f_pad * 4                    # out
                 + tq * f_pad * 4 + 2 * tq * 4)          # acc + m/l scratch
    vmem_limit = int(min(48 * 1024 * 1024, max(8 * 1024 * 1024, 2 * tile_vmem)))

    cost = pl.CostEstimate(
        flops=int(nq * nk * (2 * tq * tk * f_pad + 6 * tq * tk)),
        transcendentals=int(nq * nk * (tq * tk + tq)),
        bytes_accessed=int(n_q * n_k                      # adjacency (int8)
                           + nq * n_k * f_pad * 2         # h re-read per q tile
                           + nq * n_k * 4 + n_q * 4       # a_src / a_dst
                           + n_q * f_pad * 4),            # output
    )

    grid_spec = pltpu.PrefetchScalarGridSpec(
        num_scalar_prefetch=1,
        grid=(nq, nk),
        in_specs=[
            pl.BlockSpec((tk, f_pad), lambda qi, ki, blk: (ki, 0)),   # h (bf16)
            pl.BlockSpec((1, tk), lambda qi, ki, blk: (0, ki)),       # a_src
            pl.BlockSpec((tq, 1), lambda qi, ki, blk: (qi, 0)),       # a_dst
            pl.BlockSpec((1, f_pad), lambda qi, ki, blk: (0, 0)),     # bias
            pl.BlockSpec((tq, tk), lambda qi, ki, blk: (qi, ki)),     # adj (int8)
        ],
        out_specs=pl.BlockSpec((tq, f_pad), lambda qi, ki, blk: (qi, 0)),
        scratch_shapes=[
            pltpu.VMEM((tq, 1), jnp.float32),      # m (running max)
            pltpu.VMEM((tq, 1), jnp.float32),      # l (running denom)
            pltpu.VMEM((tq, f_pad), jnp.float32),  # acc
        ],
    )

    out_pad = pl.pallas_call(
        _breadth_kernel,
        out_shape=jax.ShapeDtypeStruct((n_q, f_pad), jnp.float32),
        grid_spec=grid_spec,
        compiler_params=pltpu.CompilerParams(
            dimension_semantics=("parallel", "arbitrary"),
            vmem_limit_bytes=vmem_limit),
        cost_estimate=cost,
    )(blk, h_pad, a_src_pad, a_dst_pad, bias_pad, adj_i8)

    return out_pad[:N, :f_out]


def _reference(x, w, att_src, att_dst, bias, adj):
    h = x @ w
    a_src = jnp.sum(h * att_src, axis=-1, keepdims=True)
    a_dst = jnp.sum(h * att_dst, axis=-1, keepdims=True)
    e = a_dst + a_src.T
    e = jnp.where(e > 0, e, 0.2 * e)
    mask = adj > 0.5
    e = jnp.where(mask, e, -1e30)
    p = jnp.exp(e - jnp.max(e, axis=-1, keepdims=True))
    p = jnp.where(mask, p, 0.0)
    alpha = p / jnp.sum(p, axis=-1, keepdims=True)
    return jnp.tanh(alpha @ h + bias)


if __name__ == "__main__":
    N, IN_DIM, OUT_DIM = 16, 8, 32  # heads = 1

    key = jax.random.PRNGKey(0)
    kx, kw, kas, kad = jax.random.split(key, 4)

    x = jax.random.normal(kx, (N, IN_DIM), dtype=jnp.float32)
    w = jax.random.normal(kw, (IN_DIM, OUT_DIM), dtype=jnp.float32) * (
        (2.0 / (IN_DIM + OUT_DIM)) ** 0.5)
    att_src = jax.random.normal(kas, (1, OUT_DIM), dtype=jnp.float32) * (
        (2.0 / (1 + OUT_DIM)) ** 0.5)
    att_dst = jax.random.normal(kad, (1, OUT_DIM), dtype=jnp.float32) * (
        (2.0 / (1 + OUT_DIM)) ** 0.5)
    bias = jnp.zeros((1, OUT_DIM), dtype=jnp.float32)

    # edge_index: ring graph, both directions (PyG convention row0=src, row1=dst)
    src = jnp.concatenate([jnp.arange(N), (jnp.arange(N) + 1) % N])
    dst = jnp.concatenate([(jnp.arange(N) + 1) % N, jnp.arange(N)])

    # Dense adjacency mask adj[dst, src] = 1, plus self loops (GATConv default).
    adj = jnp.zeros((N, N), dtype=jnp.float32)
    adj = adj.at[dst, src].set(1.0)
    adj = adj.at[jnp.arange(N), jnp.arange(N)].set(1.0)

    out = breadth_forward(x, w, att_src, att_dst, bias, adj)
    out = jax.block_until_ready(out)

    ref = _reference(x, w, att_src, att_dst, bias, adj)
    assert out.shape == (N, OUT_DIM)
    err = float(jnp.max(jnp.abs(out - ref)))
    # bf16 MXU operands (p, h) introduce a few-e-3 absolute error vs the f32 reference;
    # softmax statistics and accumulation stay f32, reciprocal is exact.
    assert err < 1e-2, f"max abs error {err}"

    print("KERNEL_OK")
</pallas_src>

<mosaic_0001>
module attributes {stable_mosaic.version = 11 : i64} {
  func.func @_breadth_kernel(%arg0: i32, %arg1: i32, %arg2: memref<2xi32, #tpu.memory_space<smem>>, %arg3: memref<128x128xbf16, #tpu.memory_space<vmem>>, %arg4: memref<1x128xf32, #tpu.memory_space<vmem>>, %arg5: memref<8x1xf32, #tpu.memory_space<vmem>>, %arg6: memref<1x128xf32, #tpu.memory_space<vmem>>, %arg7: memref<8x128xi8, #tpu.memory_space<vmem>>, %arg8: memref<8x128xf32, #tpu.memory_space<vmem>>, %arg9: memref<8x1xf32, #tpu.memory_space<vmem>>, %arg10: memref<8x1xf32, #tpu.memory_space<vmem>>, %arg11: memref<8x128xf32, #tpu.memory_space<vmem>>) attributes {dimension_semantics = [#tpu.dimension_semantics<parallel>, #tpu.dimension_semantics<arbitrary>], iteration_bounds = array<i64: 2, 1>, scalar_prefetch = 1 : i64, scratch_operands = 3 : i64, tpu.core_type = #tpu.core_type<tc>, window_params = [{transform_indices = @transform_0, window_bounds = array<i64: 128, 128>}, {transform_indices = @transform_1, window_bounds = array<i64: 1, 128>}, {transform_indices = @transform_2, window_bounds = array<i64: 8, 1>}, {pipeline_mode = #tpu.pipeline_mode<synchronous>, transform_indices = @transform_3, window_bounds = array<i64: 1, 128>}, {transform_indices = @transform_4, window_bounds = array<i64: 8, 128>}, {transform_indices = @transform_5, window_bounds = array<i64: 8, 128>}]} {
    %c0_i32 = arith.constant 0 : i32
    %0 = arith.cmpi eq, %arg1, %c0_i32 : i32
    %1 = arith.extui %0 : i1 to i32
    %c0_i32_0 = arith.constant 0 : i32
    %2 = arith.cmpi ne, %1, %c0_i32_0 : i32
    scf.if %2 {
      %cst = arith.constant -1.000000e+30 : f32
      %13 = vector.broadcast %cst : f32 to vector<8x1xf32>
      %c0 = arith.constant 0 : index
      %c0_5 = arith.constant 0 : index
      %14 = vector.load %arg9[%c0, %c0_5] : memref<8x1xf32, #tpu.memory_space<vmem>>, vector<8x1xf32>
      tpu.vector_store %arg9[%c0, %c0_5], %13 {strides = array<i32>} : memref<8x1xf32, #tpu.memory_space<vmem>>, vector<8x1xf32>,
      %cst_6 = arith.constant 0.000000e+00 : f32
      %15 = vector.broadcast %cst_6 : f32 to vector<8x1xf32>
      %c0_7 = arith.constant 0 : index
      %c0_8 = arith.constant 0 : index
      %16 = vector.load %arg10[%c0_7, %c0_8] : memref<8x1xf32, #tpu.memory_space<vmem>>, vector<8x1xf32>
      tpu.vector_store %arg10[%c0_7, %c0_8], %15 {strides = array<i32>} : memref<8x1xf32, #tpu.memory_space<vmem>>, vector<8x1xf32>,
      %cst_9 = arith.constant 0.000000e+00 : f32
      %17 = vector.broadcast %cst_9 : f32 to vector<8x128xf32>
      %c0_10 = arith.constant 0 : index
      %c0_11 = arith.constant 0 : index
      %18 = vector.load %arg11[%c0_10, %c0_11] : memref<8x128xf32, #tpu.memory_space<vmem>>, vector<8x128xf32>
      tpu.vector_store %arg11[%c0_10, %c0_11], %17 {strides = array<i32>} : memref<8x128xf32, #tpu.memory_space<vmem>>, vector<8x128xf32>,
    } else {
    }
    %c1_i32 = arith.constant 1 : i32
    %3 = arith.muli %arg0, %c1_i32 : i32
    %4 = arith.addi %3, %arg1 : i32
    %5 = arith.index_cast %4 : i32 to index
    %6 = memref.load %arg2[%5] : memref<2xi32, #tpu.memory_space<smem>>
    %c0_i32_1 = arith.constant 0 : i32
    %7 = arith.cmpi ne, %6, %c0_i32_1 : i32
    %8 = arith.extui %7 : i1 to i32
    %c0_i32_2 = arith.constant 0 : i32
    %9 = arith.cmpi ne, %8, %c0_i32_2 : i32
    scf.if %9 {
      %c0 = arith.constant 0 : index
      %c0_5 = arith.constant 0 : index
      %13 = vector.load %arg5[%c0, %c0_5] : memref<8x1xf32, #tpu.memory_space<vmem>>, vector<8x1xf32>
      %c0_6 = arith.constant 0 : index
      %c0_7 = arith.constant 0 : index
      %14 = vector.load %arg4[%c0_6, %c0_7] : memref<1x128xf32, #tpu.memory_space<vmem>>, vector<1x128xf32>
      %15 = vector.broadcast %13 : vector<8x1xf32> to vector<8x128xf32>
      %16 = vector.broadcast %14 : vector<1x128xf32> to vector<8x128xf32>
      %17 = arith.addf %15, %16 : vector<8x128xf32>
      %cst = arith.constant 0.000000e+00 : f32
      %18 = vector.broadcast %cst : f32 to vector<8x128xf32>
      %19 = arith.cmpf ogt, %17, %18 : vector<8x128xf32>
      %cst_8 = arith.constant 2.000000e-01 : f32
      %20 = vector.broadcast %cst_8 : f32 to vector<8x128xf32>
      %21 = arith.mulf %20, %17 : vector<8x128xf32>
      %22 = arith.select %19, %17, %21 : vector<8x128xi1>, vector<8x128xf32>
      %c0_9 = arith.constant 0 : index
      %c0_10 = arith.constant 0 : index
      %23 = vector.load %arg7[%c0_9, %c0_10] : memref<8x128xi8, #tpu.memory_space<vmem>>, vector<8x128xi8>
      %c0_i8 = arith.constant 0 : i8
      %24 = vector.broadcast %c0_i8 : i8 to vector<8x128xi8>
      %25 = arith.cmpi ne, %23, %24 : vector<8x128xi8>
      %cst_11 = arith.constant -1.000000e+30 : f32
      %26 = vector.broadcast %cst_11 : f32 to vector<8x128xf32>
      %27 = arith.select %25, %22, %26 : vector<8x128xi1>, vector<8x128xf32>
      %c0_12 = arith.constant 0 : index
      %c0_13 = arith.constant 0 : index
      %28 = vector.load %arg9[%c0_12, %c0_13] : memref<8x1xf32, #tpu.memory_space<vmem>>, vector<8x1xf32>
      %cst_14 = arith.constant dense<0xFF800000> : vector<8xf32>
      %29 = vector.multi_reduction <maximumf>, %27, %cst_14 [1] : vector<8x128xf32> to vector<8xf32>
      %30 = vector.shape_cast %29 : vector<8xf32> to vector<8x1xf32>
      %31 = arith.maximumf %28, %30 : vector<8x1xf32>
      %32 = arith.subf %28, %31 : vector<8x1xf32>
      %33 = math.exp %32 : vector<8x1xf32>
      %34 = vector.broadcast %31 : vector<8x1xf32> to vector<8x128xf32>
      %35 = arith.subf %27, %34 : vector<8x128xf32>
      %36 = math.exp %35 : vector<8x128xf32>
      %c0_15 = arith.constant 0 : index
      %c0_16 = arith.constant 0 : index
      %37 = vector.load %arg10[%c0_15, %c0_16] : memref<8x1xf32, #tpu.memory_space<vmem>>, vector<8x1xf32>
      %38 = arith.mulf %33, %37 : vector<8x1xf32>
      %cst_17 = arith.constant dense<0.000000e+00> : vector<8xf32>
      %39 = vector.multi_reduction <add>, %36, %cst_17 [1] : vector<8x128xf32> to vector<8xf32>
      %40 = vector.shape_cast %39 : vector<8xf32> to vector<8x1xf32>
      %41 = arith.addf %38, %40 : vector<8x1xf32>
      %c0_18 = arith.constant 0 : index
      %c0_19 = arith.constant 0 : index
      %42 = vector.load %arg10[%c0_18, %c0_19] : memref<8x1xf32, #tpu.memory_space<vmem>>, vector<8x1xf32>
      tpu.vector_store %arg10[%c0_18, %c0_19], %41 {strides = array<i32>} : memref<8x1xf32, #tpu.memory_space<vmem>>, vector<8x1xf32>,
      %c0_20 = arith.constant 0 : index
      %c0_21 = arith.constant 0 : index
      %43 = vector.load %arg11[%c0_20, %c0_21] : memref<8x128xf32, #tpu.memory_space<vmem>>, vector<8x128xf32>
      %44 = vector.broadcast %33 : vector<8x1xf32> to vector<8x128xf32>
      %45 = arith.mulf %44, %43 : vector<8x128xf32>
      %46 = arith.truncf %36 : vector<8x128xf32> to vector<8x128xbf16>
      %c0_22 = arith.constant 0 : index
      %c0_23 = arith.constant 0 : index
      %47 = vector.load %arg3[%c0_22, %c0_23] : memref<128x128xbf16, #tpu.memory_space<vmem>>, vector<128x128xbf16>
      %cst_24 = arith.constant dense<0.000000e+00> : vector<8x128xf32>
      %48 = tpu.matmul %46, %47, %cst_24 {dimension_numbers = #tpu.dot_dimension_numbers<[1], [0], [0], [1], [0, 0, 1, 1], [], []>} : vector<8x128xbf16>, vector<128x128xbf16>, vector<8x128xf32> -> vector<8x128xf32>
      %49 = arith.addf %45, %48 : vector<8x128xf32>
      %c0_25 = arith.constant 0 : index
      %c0_26 = arith.constant 0 : index
      %50 = vector.load %arg11[%c0_25, %c0_26] : memref<8x128xf32, #tpu.memory_space<vmem>>, vector<8x128xf32>
      tpu.vector_store %arg11[%c0_25, %c0_26], %49 {strides = array<i32>} : memref<8x128xf32, #tpu.memory_space<vmem>>, vector<8x128xf32>,
      %c0_27 = arith.constant 0 : index
      %c0_28 = arith.constant 0 : index
      %51 = vector.load %arg9[%c0_27, %c0_28] : memref<8x1xf32, #tpu.memory_space<vmem>>, vector<8x1xf32>
      tpu.vector_store %arg9[%c0_27, %c0_28], %31 {strides = array<i32>} : memref<8x1xf32, #tpu.memory_space<vmem>>, vector<8x1xf32>,
    } else {
    }
    %c0_i32_3 = arith.constant 0 : i32
    %10 = arith.cmpi eq, %arg1, %c0_i32_3 : i32
    %11 = arith.extui %10 : i1 to i32
    %c0_i32_4 = arith.constant 0 : i32
    %12 = arith.cmpi ne, %11, %c0_i32_4 : i32
    scf.if %12 {
      %c0 = arith.constant 0 : index
      %c0_5 = arith.constant 0 : index
      %13 = vector.load %arg10[%c0, %c0_5] : memref<8x1xf32, #tpu.memory_space<vmem>>, vector<8x1xf32>
      %cst = arith.constant 0.000000e+00 : f32
      %14 = vector.broadcast %cst : f32 to vector<8x1xf32>
      %15 = arith.cmpf ogt, %13, %14 : vector<8x1xf32>
      %cst_6 = arith.constant 1.000000e+00 : f32
      %16 = vector.broadcast %cst_6 : f32 to vector<8x1xf32>
      %17 = arith.select %15, %13, %16 : vector<8x1xi1>, vector<8x1xf32>
      %18 = tpu.reciprocal %17 : vector<8x1xf32> -> vector<8x1xf32>
      %c0_7 = arith.constant 0 : index
      %c0_8 = arith.constant 0 : index
      %19 = vector.load %arg11[%c0_7, %c0_8] : memref<8x128xf32, #tpu.memory_space<vmem>>, vector<8x128xf32>
      %20 = vector.broadcast %18 : vector<8x1xf32> to vector<8x128xf32>
      %21 = arith.mulf %19, %20 : vector<8x128xf32>
      %c0_9 = arith.constant 0 : index
      %c0_10 = arith.constant 0 : index
      %22 = vector.load %arg6[%c0_9, %c0_10] : memref<1x128xf32, #tpu.memory_space<vmem>>, vector<1x128xf32>
      %23 = vector.broadcast %22 : vector<1x128xf32> to vector<8x128xf32>
      %24 = arith.addf %21, %23 : vector<8x128xf32>
      %25 = math.tanh %24 : vector<8x128xf32>
      %c0_11 = arith.constant 0 : index
      %c0_12 = arith.constant 0 : index
      %26 = vector.load %arg8[%c0_11, %c0_12] : memref<8x128xf32, #tpu.memory_space<vmem>>, vector<8x128xf32>
      tpu.vector_store %arg8[%c0_11, %c0_12], %25 {strides = array<i32>} : memref<8x128xf32, #tpu.memory_space<vmem>>, vector<8x128xf32>,
    } else {
    }
    return
  }
  func.func @transform_0(%arg0: i32, %arg1: i32, %arg2: memref<2xi32, #tpu.memory_space<smem>>) -> (i32, i32) {
    %c0_i32 = arith.constant 0 : i32
    %c0_i32_0 = arith.constant 0 : i32
    return %arg1, %c0_i32 : i32, i32
  }
  func.func @transform_1(%arg0: i32, %arg1: i32, %arg2: memref<2xi32, #tpu.memory_space<smem>>) -> (i32, i32) {
    %c0_i32 = arith.constant 0 : i32
    %c0_i32_0 = arith.constant 0 : i32
    return %c0_i32, %arg1 : i32, i32
  }
  func.func @transform_2(%arg0: i32, %arg1: i32, %arg2: memref<2xi32, #tpu.memory_space<smem>>) -> (i32, i32) {
    %c0_i32 = arith.constant 0 : i32
    %c0_i32_0 = arith.constant 0 : i32
    return %arg0, %c0_i32 : i32, i32
  }
  func.func @transform_3(%arg0: i32, %arg1: i32, %arg2: memref<2xi32, #tpu.memory_space<smem>>) -> (i32, i32) {
    %c0_i32 = arith.constant 0 : i32
    %c0_i32_0 = arith.constant 0 : i32
    %c0_i32_1 = arith.constant 0 : i32
    return %c0_i32, %c0_i32_0 : i32, i32
  }
  func.func @transform_4(%arg0: i32, %arg1: i32, %arg2: memref<2xi32, #tpu.memory_space<smem>>) -> (i32, i32) {
    %c0_i32 = arith.constant 0 : i32
    return %arg0, %arg1 : i32, i32
  }
  func.func @transform_5(%arg0: i32, %arg1: i32, %arg2: memref<2xi32, #tpu.memory_space<smem>>) -> (i32, i32) {
    %c0_i32 = arith.constant 0 : i32
    %c0_i32_0 = arith.constant 0 : i32
    return %arg0, %c0_i32 : i32, i32
  }
}

</mosaic_0001>

<bundles_post_ra>
// kernel: tpu_custom_call.1
= control target key start
LH: loop header
LB: loop body
LE: loop exit
PB: predicated region body
PF: predicated region fallthrough
CT: control target
= control target key end

     0   :  { %s1099_s0 = inlined_call_operand.vmem [shape: s32[2], index: 0, kind: input, shape index: {}]   ;;  %s1100_s1 = inlined_call_operand.hbm [shape: bf16[128,128], index: 1, kind: input, shape index: {}]   ;;  %s1101_s2 = inlined_call_operand.vmem [shape: f32[1,128], index: 2, kind: input, shape index: {}]   ;;  %s1102_s3 = inlined_call_operand.vmem [shape: f32[16,1], index: 3, kind: input, shape index: {}]   ;;  %s1103_s4 = inlined_call_operand.vmem [shape: f32[1,128], index: 4, kind: input, shape index: {}]   ;;  %s1104_s5 = inlined_call_operand.vmem [shape: s8[16,128], index: 5, kind: input, shape index: {}]   ;;  %s1105_s6 = inlined_call_operand.hbm [shape: f32[16,128], index: 6, kind: output, shape index: {}]  }
   0x1   :  { %s11_s23 = sshll.u32 %s1099_s0, 4  ;;  %s12_s23 = int_to_ptr.vmem [resolvable:$true] %s11_s23 }
   0x2   :  { %s777_s24 = scalar_lea.vmem %s12_s23, 16  ;;  %p782_p1 = scmp.lt.s32.totalorder %s12_s23, %s12_s23 }
   0x3   :  { %p778_p0 = scmp.ne.s32.totalorder %s12_s23, %s777_s24  ;;  %p783_p2 = scmp.lt.s32.totalorder %s777_s24, %s777_s24 }
   0x5   :  { %p784_p3 = por %p783_p2, %p782_p1 }
   0x7   :  { %p785_p4 = pnand %p784_p3, %p778_p0 }
   0x9   :  { %788 = shalt.err (!%p785_p4)  }
   0xa   :  { %s899_s25 = smov [#allocation6]  }
   0xb   :  { %14 = dma.vmem_to_smem %s12_s23, 16, %s899_s25, [#allocation5] }
   0xc   :  { %865 = dma.done.wait [#allocation5], 16 }
   0xd   :  { %866 = vsyncadd [#allocation5], 4294967280 }
   0xe   :  { %16 = sfence }
   0xf   :  { %17 = vsyncpa [#allocation8], 0 }
  0x10   :  { %18 = vsyncpa [#allocation9], 0 }
  0x11   :  { %20 = vsyncpa [#allocation9 + $0x1], 0  ;;  %s948_s26 = smov 0   ;;  %s950_s27 = smov 0  }
  0x12   :  { %s952_s0 = smov 0   ;;  %s954_s28 = smov 0  }
  0x13   :  { %s956_s29 = smov 0   ;;  %s958_s30 = smov 0  }
  0x14 LB: > { %s628_s7 = sadd.s32 4294967295, %s897_s30   ;;  %s629_s8 = sadd.s32 4294967294, %s897_s30   ;;  %s897_s30 = sphi %s958_s30, %s26_s30   ;;  %s893_s29 = sphi %s956_s29, %s1114_s29   ;;  %s889_s28 = sphi %s954_s28, %s1113_s28   ;;  %s885_s0 = sphi %s952_s0, %s1112_s0   ;;  %s881_s27 = sphi %s950_s27, %s1111_s27   ;;  %s877_s26 = sphi %s948_s26, %s1110_s26  }
  0x15   : > { %s38_s9 = sadd.s32 1, %s893_s29  ;;  %s172_s10 = sadd.s32 1, %s885_s0 }
  0x16   : > { %p40_p5 = scmp.ge.s32.totalorder %s38_s9, 2  ;;  %p182_p6 = scmp.ne.s32.totalorder %s885_s0, %s881_s27 }
  0x17   : > { %p183_p7 = scmp.eq.s32.totalorder %s628_s7, 1  ;;  %p188_p8 = scmp.ne.s32.totalorder %s881_s27, %s877_s26 }
  0x18   : > { %s1116_s9 = smov (%p40_p5, %s38_s9), 0  ;;  %p189_p10 = scmp.eq.s32.totalorder %s629_s8, 1 }
  0x19   : > { %p988_p9 = por %p183_p7, %p182_p6  ;;  %s169_s12 = ssub.s32 %s893_s29, %s1116_s9 }
  0x1a   : > { %p630_p11 = scmp.ge.s32.totalorder %s897_s30, 1  ;;  %p170_p12 = scmp.eq.s32.totalorder %s169_s12, 0 }
  0x1b   : > { %p995_p13 = por %p189_p10, %p188_p8  ;;  %p196_p0 = scmp.lt.s32.totalorder %s897_s30, 3 }
  0x1c   : > { %s1001_s14 = scalar_select %p170_p12, %s885_s0, %s172_s10  }
  0x1d   : > { %p1003_p1 = pnand %p630_p11, %p196_p0  ;;  %p1007_p2 = scmp.eq.s32.totalorder %s628_s7, 0 }
  0x1e   : > { %s900_s17 = smov [#allocation7]  }
  0x1f   : > { %p689_p3 = pneg %p1003_p1  ;;  %s211_s18 = sshll.u32 %s900_s17, 4  ;;  %s212_s18 = int_to_ptr.vmem [resolvable:$true] %s211_s18 }
  0x20   : > { %s800_s19 = scalar_lea.vmem %s212_s18, 1024  ;;  %p808_p10 = scmp.lt.s32.totalorder %s212_s18, %s212_s18 }
  0x21   : > { %p690_p4 = pnand %p1007_p2, %p689_p3  ;;  %p801_p6 = scmp.ne.s32.totalorder %s212_s18, %s800_s19 }
  0x22   : > { %p809_p11 = scmp.lt.s32.totalorder %s800_s19, %s800_s19 }
  0x23   : > { %p791_p5 = pneg %p690_p4 }
  0x24   : > { %p810_p12 = por %p809_p11, %p808_p10 }
  0x25   : > { %p803_p7 = pnand %p801_p6, %p791_p5 }
  0x27   : > { %p804_p8 = pneg %p803_p7 }
  0x29   : > { %p811_p0 = pnand %p810_p12, %p804_p8 }
  0x2b   : > { %814 = shalt.err (!%p811_p0)
}
  0x2c   : > { %s901_s20 = smov 64   ;;  %s902_s21 = smov 4  }
  0x2d   : > { %692 = dma.hbm_to_vmem [thread:$0]  (!%p690_p4), %s1100_s1, 1024, %s212_s18, [#allocation8], %s901_s20, %s901_s20, %s902_s21  }
  0x2e   : > { %253 = sbr.rel (%p1003_p1) target bundleno = 853 (0x355), region = 40 }
  0x33   : > { %868 = dma.done.wait (%p1007_p2), [#allocation8], 1024  }
  0x34   : > { %870 = vsyncadd (%p1007_p2), [#allocation8], 4294966272  ;;  %s287_s24 = sand.u32 1, %s881_s27   ;;  %p294_p3 = scmp.lt.s32.totalorder %s889_s28, 1  ;;  %vm312_vm0 = vcmask 7168   ;;  %v903_v0 = vmov 0.0  }
  0x35   : > { %s317_s25 = sld [smem:[#allocation6 + %s889_s28]]  ;;  %s1029_s7 = sshll.u32 %s287_s24, 3  ;;  %314 = vst.msk [vmem:[#allocation3] sm:$0xff] %vm312_vm0, %v903_v0  ;;  %315 = vst [vmem:[#allocation4] sm:$0xff] %v903_v0  ;;  %v904_v1 = vmov -1e+30  }
  0x36   : > { %313 = vst.msk [vmem:[#allocation2] sm:$0xff] %vm312_vm0, %v904_v1  ;;  %s295_s8 = scalar_select %p294_p3, %s889_s28, 1 }
  0x37   : > { %s289_s21 = scalar_lea.vmem [#allocation10], %s1029_s7 }
  0x38   : > { %s637_s10 = sshll.u32 %s295_s8, 3  ;;  %s638_s12 = sshll.u32 %s295_s8, 1 }
  0x39   : > { %s297_s17 = scalar_lea.vmem %s1102_s3, %s637_s10  ;;  %s304_s20 = scalar_lea.vmem %s1104_s5, %s638_s12 }
  0x3b   : > { %p639_p1 = scmp.eq.s32.totalorder %s317_s25, 0 }
  0x3d   : > { %321 = sbr.rel (%p639_p1) target bundleno = 681 (0x2a9), region = 52 }
  0x42   : > { %v322_v2 = vld [vmem:[%s297_s17] sm:$0xff]  ;;  %v905_v3 = vmov 0   ;;  %v760_v13 = vld [vmem:[#allocation7 + $0x38] sm:$0xff]   ;;  %v906_v14 = vmov 0.0   ;;  %v761_v15 = vld [vmem:[#allocation7 + $0x30] sm:$0xff]   ;;  %vm907_vm4 = vmmov 0  }
  0x43   : > { %758 = vset.pattern.permute.xlu0 %v905_v3  ;;  %759 = vset.pattern.permute.xlu1 %v905_v3  ;;  %v339_v4 = vld [vmem:[%s304_s20] sm:$0x3]  ;;  %v763_v18 = vld [vmem:[#allocation7 + $0x20] sm:$0xff]   ;;  %v764_v21 = vld [vmem:[#allocation7 + $0x18] sm:$0xff]  }
  0x44   : > { %326 = vperm.xlu0 %758, %v322_v2   ;;  %vm340_vm1 = vnez %v339_v4  ;;  %v640_v6 = vld [vmem:[%s1101_s2] ss:$0 sm:$0xff]  ;;  %663 = vmatprep.subr.bf16.mxu0 %v906_v14  ;;  %v765_v23 = vld [vmem:[#allocation7 + $0x10] sm:$0xff]   ;;  %v767_v26 = vld [vmem:[#allocation7] sm:$0xff]  }
  0x45   : > { %v341_v5 = vsel %vm340_vm1, 16843009, %v905_v3  ;;  %664 = vmatpush3.bf16.msra.mxu0 %v760_v13  ;;  %v762_v16 = vld [vmem:[#allocation7 + $0x28] sm:$0xff]   ;;  %679 = vmatprep.mubr.msk.bf16.mxu0 %vm907_vm4, %v906_v14  ;;  %v360_v33 = vld [vmem:[#allocation3] sm:$0xff]  ;;  %v367_v37 = vld [vmem:[#allocation4] sm:$0xff] }
  0x46   : > { %v342_v7 = vunpack.c.0.s8 %v341_v5  ;;  %665 = vmatprep.subr.bf16.mxu0 %v906_v14  ;;  %v345_v17 = vld [vmem:[#allocation2] sm:$0xff] }
  0x47   : > { %v766_v25 = vld [vmem:[#allocation7 + $0x8] sm:$0xff]  }
  0x48   : > { %vm343_vm3 = vcmp.ne.s32.totalorder %v342_v7, 0 }
  0x49   : > { %666 = vmatpush3.bf16.msra.mxu0 %v761_v15 }
  0x4a   : > { %667 = vmatprep.subr.bf16.mxu0 %v906_v14 }
  0x4d   : > { %668 = vmatpush3.bf16.msra.mxu0 %v762_v16 }
  0x4e   : > { %669 = vmatprep.subr.bf16.mxu0 %v906_v14 }
  0x51   : > { %670 = vmatpush3.bf16.msra.mxu0 %v763_v18 }
  0x52   : > { %671 = vmatprep.subr.bf16.mxu0 %v906_v14 }
  0x55   : > { %672 = vmatpush3.bf16.msra.mxu0 %v764_v21 }
  0x56   : > { %673 = vmatprep.subr.bf16.mxu0 %v906_v14 }
  0x59   : > { %674 = vmatpush3.bf16.msra.mxu0 %v765_v23 }
  0x5a   : > { %675 = vmatprep.subr.bf16.mxu0 %v906_v14 }
  0x5d   : > { %676 = vmatpush3.bf16.msra.mxu0 %v766_v25 }
  0x5e   : > { %677 = vmatprep.subr.bf16.mxu0 %v906_v14 }
  0x61   : > { %678 = vmatpush3.bf16.msra.mxu0 %v767_v26 }
  0xbf   : > { %v327_v8 = vpop.permute.xlu0 %326 }
  0xc0   : > { %v335_v9 = vadd.f32 %v640_v6, %v327_v8 }
  0xc2   : > { %v337_v10 = vmul.f32 0.2, %v335_v9  ;;  %vm336_vm2 = vcmp.gt.f32.partialorder %v335_v9, 0.0 }
  0xc4   : > { %v338_v11 = vsel %vm336_vm2, %v335_v9, %v337_v10 }
  0xc5   : > { %v344_v12 = vsel %vm343_vm3, %v338_v11, -1e+30 }
  0xc6   : > { %346 = vmax.xlane.f32.xlu0 %v344_v12 }
 0x14f   : > { %v347_v19 = vpop.xlane.xlu0 %346 }
 0x150   : > { %v348_v20 = vmax.f32 %v345_v17, %v347_v19 }
 0x152   : > { %v349_v22 = vsub.f32 %v345_v17, %v348_v20  ;;  %481 = vst.msk [vmem:[#allocation2] sm:$0xff] %vm312_vm0, %v348_v20  ;;  %354 = vperm.xlu1 %759, %v348_v20  }
 0x154   : > { %v350_v24 = vmul.f32 1.442695, %v349_v22 }
 0x156   : > { %768 = vpow2.f32 %v350_v24 }
 0x163   : > { %v769_v27 = vpop.eup %768 }
 0x164   : > { %370 = vperm.xlu0 %758, %v769_v27   ;;  %v361_v34 = vmul.f32 %v769_v27, %v360_v33 }
 0x1cd   : > { %v355_v28 = vpop.permute.xlu1 %354 }
 0x1ce   : > { %v357_v29 = vsub.f32 %v344_v12, %v355_v28 }
 0x1d0   : > { %v358_v30 = vmul.f32 1.442695, %v357_v29 }
 0x1d2   : > { %770 = vpow2.f32 %v358_v30 }
 0x1df   : > { %v771_v31 = vpop.eup %770  ;;  %v371_v38 = vpop.permute.xlu0 %370 }
 0x1e0   : > { %362 = vadd.xlane.f32.xlu1 %v771_v31  ;;  %v374_v32 = vpack.c.bf16 %v771_v31, %v771_v31  ;;  %v373_v39 = vmul.f32 %v371_v38, %v367_v37 }
 0x1e2   : > { %680 = vmatmul.mubr.bf16.vlgmr.msra.gmra.mxu0 %v374_v32 }
 0x269   : > { %v363_v35 = vpop.xlane.xlu1 %362 }
 0x26a   : > { %v364_v36 = vadd.f32 %v363_v35, %v361_v34 }
 0x26c   : > { %366 = vst.msk [vmem:[#allocation3] sm:$0xff] %vm312_vm0, %v364_v36 }
 0x2a2   : > { %v473_v40 = vpop.f32.mrf.mxu0 }
 0x2a3   : > { %v479_v41 = vadd.f32 %v473_v40, %v373_v39 }
 0x2a4   : > { %v681_v42 = vpop.f32.mrf.mxu0 }
 0x2a5   : > { %480 = vst [vmem:[#allocation4] sm:$0xff] %v479_v41 }
 0x2a6   : > { %v476_v43 = vpop.f32.mrf.mxu0 }
 0x2a8   : > { %v682_v44 = vpop.f32.mrf.mxu0 }
 0x2a9 PF: > { %v485_v45 = vld [vmem:[#allocation3] sm:$0xff]  ;;  %v908_v46 = vmov 0   ;;  %v649_v50 = vld [vmem:[%s1103_s4] ss:$0 sm:$0xff]  ;;  %s651_s10 = sshll.u32 %s889_s28, 7  ;;  %s520_s12 = sshll.u32 %s289_s21, 4  ;;  %s521_s12 = int_to_ptr.vmem [resolvable:$true] %s520_s12 }
 0x2aa   : > { %772 = vset.pattern.permute.xlu0 %v908_v46  ;;  %vm486_vm5 = vcmp.gt.f32.partialorder %v485_v45, 0.0  ;;  %s1055_s17 = scalar_lea.hbm %s1105_s6, %s651_s10  ;;  %s507_s18 = scalar_lea.sflag [#allocation9], %s287_s24 }
 0x2ab   : > { %v487_v47 = vsel %vm486_vm5, %v485_v45, 1.0  ;;  %s815_s19 = scalar_lea.vmem %s521_s12, 128  ;;  %s909_s20 = smov [#allocation10]  }
 0x2ac   : > { %773 = vrcp.f32 %v487_v47  ;;  %v489_v49 = vld [vmem:[#allocation4] sm:$0xff]  ;;  %p816_p2 = scmp.ne.s32.totalorder %s521_s12, %s815_s19  ;;  %s819_s28 = sshll.u32 %s909_s20, 4  ;;  %s820_s28 = int_to_ptr.vmem [resolvable:$false] %s819_s28 }
 0x2ad   : > { %s821_s22 = scalar_lea.vmem %s820_s28, 256  ;;  %p822_p6 = scmp.lt.s32.totalorder %s521_s12, %s820_s28 }
 0x2ae   : > { %p817_p4 = pnand %p816_p2, %p988_p9  ;;  %p823_p7 = scmp.lt.s32.totalorder %s821_s22, %s815_s19 }
 0x2b0   : > { %p818_p5 = pneg %p817_p4  ;;  %p824_p8 = por %p823_p7, %p822_p6 }
 0x2b2   : > { %p825_p10 = pnand %p824_p8, %p818_p5 }
 0x2b9   : > { %v774_v48 = vpop.eup %773 }
 0x2ba   : > { %492 = vperm.xlu0 %772, %v774_v48  }
 0x335   : > { %v493_v51 = vpop.permute.xlu0 %492 }
 0x336   : > { %v495_v52 = vmul.f32 %v493_v51, %v489_v49 }
 0x338   : > { %v503_v53 = vadd.f32 %v649_v50, %v495_v52 }
 0x33a   : > { %775 = vtanh.f32 %v503_v53 }
 0x347   : > { %v776_v54 = vpop.eup %775 }
 0x348   : > { %505 = vst [vmem:[%s289_s21] sm:$0xff] %v776_v54 }
 0x349   : > { %828 = shalt.err (!%p825_p10)
}
 0x34a   : > { %s829_s7 = scalar_lea.hbm %s1055_s17, 128  ;;  %s833_s23 = scalar_lea.hbm %s1105_s6, 256 }
 0x34b   : > { %p830_p11 = scmp.ne.s32.totalorder %s1055_s17, %s829_s7  ;;  %p834_p3 = scmp.lt.s32.totalorder %s1055_s17, %s1105_s6 }
 0x34c   : > { %p835_p1 = scmp.lt.s32.totalorder %s833_s23, %s829_s7 }
 0x34d   : > { %p831_p12 = pnand %p830_p11, %p988_p9 }
 0x34e   : > { %p836_p2 = por %p835_p1, %p834_p3 }
 0x34f   : > { %p832_p0 = pneg %p831_p12 }
 0x351   : > { %p837_p4 = pnand %p836_p2, %p832_p0 }
 0x353   : > { %840 = shalt.err (!%p837_p4)
}
 0x354   : > { %687 = dma.vmem_to_hbm [thread:$0]  (%p988_p9), %s521_s12, 128, %s1055_s17, %s507_s18  }
 0x355 PF: > { %p699_p5 = scmp.ge.s32.totalorder %s897_s30, 2  ;;  %s532_s10 = sand.u32 1, %s877_s26  }
 0x356   : > { %s533_s15 = scalar_lea.sflag [#allocation9], %s532_s10 }
 0x357   : > { %p694_p6 = pnand %p699_p5, %p995_p13 }
 0x359   : > { %p695_p7 = pneg %p694_p6 }
 0x35b   : > { %872 = dma.done.wait (%p695_p7), %s533_s15, 128  }
 0x35c   : > { %874 = vsyncadd (%p695_p7), %s533_s15, 4294967168  ;;  %s26_s30 = sadd.s32 1, %s897_s30   ;;  %s1110_s26 = smov %s881_s27 }
 0x35d   : > { %p23_p8 = scmp.ge.s32.totalorder %s26_s30, 4   ;;  %s1111_s27 = smov %s885_s0 }
 0x35e   : > { %s1112_s0 = smov %s1001_s14  ;;  %s1113_s28 = smov %s893_s29 }
 0x35f   : > { %s1114_s29 = smov %s1116_s9  ;;  %25 = sbr.rel (!%p23_p8) target bundleno = 20 (0x14), region = 99 }
 0x364   :  { %538 = vsyncpa [#allocation8], 1 }
 0x365   :  { %540 = vsyncpa [#allocation8 + $0x1], 1 }
 0x366   :  { %541 = vsyncpa [#allocation9], 1 }
 0x367   :  { %543 = vsyncpa [#allocation9 + $0x1], 1 }

</bundles_post_ra>
